<compile_context>
chip_gen: v6e
topology: v6e:2x2x1
jax: 0.10.0
libtpu: 0.0.40
codegen_flags: <defaults>
</compile_context>

<pallas_src>
import functools
import math

import jax
import jax.numpy as jnp
from jax import lax
from jax.experimental import pallas as pl
from jax.experimental.pallas import tpu as pltpu


def _cdiv(a, b):
    return -(-a // b)


def _round_up(x, m):
    return ((x + m - 1) // m) * m


def _sublane_multiple(dtype):
    # f32 -> 8, bf16 -> 16, int8/fp8 -> 32 (packed sublanes).
    return max(8, 32 // jnp.dtype(dtype).itemsize)


def _choose_tile(dim, max_tile, mult):
    """Tile <= max_tile that minimizes trailing-block waste.

    Returns either the full dim (always a legal block shape) or a multiple of
    `mult` that splits `dim` into cdiv(dim, max_tile) near-equal pieces.
    """
    if dim <= max_tile:
        return dim
    n = _cdiv(dim, max_tile)
    return min(_round_up(_cdiv(dim, n), mult), max_tile)


def _choose_tk(I):
    """K tile. Must divide I exactly: a partial trailing K block would feed
    undefined out-of-bounds data into the accumulator."""
    if I <= 2048:
        return I
    for cand in (2048, 1536, 1024, 768, 512, 384, 256, 128):
        if I % cand == 0:
            return cand
    # TODO(synk): awkward large I with no 128-multiple divisor -- keep K untiled
    # (correct; the VMEM limit below is sized to match) rather than risk garbage
    # in the reduction.
    return I


def _td_matmul_kernel(d_ref, w_ref, b_ref, o_ref, acc_ref, *, mxu_dtype, k_tiled):
    # d_ref: (tm, tk)  input tile
    # w_ref: (to, tk)  weight tile, PyTorch [out, in] layout (no wrapper transpose)
    # b_ref: (1, to)   bias tile
    # o_ref: (tm, to)  output tile
    # acc_ref: (tm, to) f32 accumulator scratch (used only when K is tiled)
    lhs = d_ref[...]
    rhs = w_ref[...]
    if mxu_dtype is not None:
        lhs = lhs.astype(mxu_dtype)
        rhs = rhs.astype(mxu_dtype)
    part = lax.dot_general(
        lhs, rhs,
        dimension_numbers=(((1,), (1,)), ((), ())),      # d @ W.T on the MXU
        preferred_element_type=jnp.float32)

    def _epilogue(acc):
        g = jnp.maximum(acc + b_ref[...].astype(jnp.float32), 0.0)
        o_ref[...] = jnp.exp(-g).astype(o_ref.dtype)

    if k_tiled:
        k = pl.program_id(2)

        @pl.when(k == 0)
        def _():
            acc_ref[...] = jnp.zeros_like(acc_ref)

        acc_ref[...] += part

        @pl.when(k == pl.num_programs(2) - 1)
        def _():
            _epilogue(acc_ref[...])
    else:
        _epilogue(part)


def _td_diag_kernel(d_ref, w_ref, b_ref, o_ref):
    # diag fast path: exp(-relu(d * diag(W) + b)), pure VPU/EUP (no MXU, no eye mask).
    # TODO(synk): with bf16 inputs on v6e/v7x this could stay in bf16 (bf16 VPU/EUP);
    # kept in f32 so v5e and the strict f32 check both hold.
    g = (d_ref[...].astype(jnp.float32) * w_ref[...].astype(jnp.float32)
         + b_ref[...].astype(jnp.float32))
    o_ref[...] = jnp.exp(-jnp.maximum(g, 0.0)).astype(o_ref.dtype)


def _vmem_limit(nbytes):
    return int(min(max(nbytes + (4 << 20), 16 << 20), 128 << 20))


def temporal_decay(d, W, b, *, diag=False, mxu_dtype=None):
    """gamma = exp(-relu(linear(d, W (diag-masked if diag), b)))."""
    O, I = W.shape
    B, I2 = d.shape
    assert I2 == I
    dsz = jnp.dtype(d.dtype).itemsize

    tm = _choose_tile(B, 512, _sublane_multiple(d.dtype))
    nbt = _cdiv(B, tm)

    if diag:
        assert I == O, "diag=True requires input_size == output_size"
        w_diag = jnp.diagonal(W).reshape(1, I).astype(jnp.float32)
        b2 = b.reshape(1, I).astype(jnp.float32)
        vmem = 2 * (tm * I * dsz        # d blocks (double-buffered)
                    + tm * I * dsz      # out blocks
                    + 2 * I * 4)        # w_diag + b
        return pl.pallas_call(
            _td_diag_kernel,
            out_shape=jax.ShapeDtypeStruct((B, I), d.dtype),
            grid_spec=pltpu.PrefetchScalarGridSpec(
                num_scalar_prefetch=0,
                grid=(nbt,),
                in_specs=[
                    pl.BlockSpec((tm, I), lambda i: (i, 0)),
                    pl.BlockSpec((1, I), lambda i: (0, 0)),
                    pl.BlockSpec((1, I), lambda i: (0, 0)),
                ],
                out_specs=pl.BlockSpec((tm, I), lambda i: (i, 0)),
            ),
            compiler_params=pltpu.CompilerParams(
                dimension_semantics=("parallel",),
                vmem_limit_bytes=_vmem_limit(vmem)),
        )(d, w_diag, b2)

    # Dense path.
    to = _choose_tile(O, 512, 128)
    nto = _cdiv(O, to)
    tk = _choose_tk(I)
    nkt = I // tk
    k_tiled = nkt > 1
    b2 = b.reshape(1, O)

    # Grid order: fetch the heavier operand once (with K untiled, the operand
    # whose block index is constant across the inner axis is not re-DMA'd).
    batch_outer = (B * I + nbt * O * I) <= (O * I + nto * B * I)
    if batch_outer:
        grid = (nbt, nto, nkt)
        d_map = lambda i, j, k: (i, k)
        w_map = lambda i, j, k: (j, k)
        b_map = lambda i, j, k: (0, j)
        o_map = lambda i, j, k: (i, j)
    else:
        grid = (nto, nbt, nkt)
        d_map = lambda j, i, k: (i, k)
        w_map = lambda j, i, k: (j, k)
        b_map = lambda j, i, k: (0, j)
        o_map = lambda j, i, k: (i, j)

    vmem = 2 * (tm * tk * dsz
                + to * tk * jnp.dtype(W.dtype).itemsize
                + to * jnp.dtype(b.dtype).itemsize
                + tm * to * dsz) + tm * to * 4   # + f32 accumulator

    kernel = functools.partial(_td_matmul_kernel, mxu_dtype=mxu_dtype,
                               k_tiled=k_tiled)
    # TODO(synk): at B=8 there is a single batch grid step, so v7x's second
    # TensorCore idles; batching several timesteps/cells per call would fix that.
    return pl.pallas_call(
        kernel,
        out_shape=jax.ShapeDtypeStruct((B, O), d.dtype),
        grid_spec=pltpu.PrefetchScalarGridSpec(
            num_scalar_prefetch=0,
            grid=grid,
            in_specs=[
                pl.BlockSpec((tm, tk), d_map),
                pl.BlockSpec((to, tk), w_map),
                pl.BlockSpec((1, to), b_map),
            ],
            out_specs=pl.BlockSpec((tm, to), o_map),
            scratch_shapes=[pltpu.VMEM((tm, to), jnp.float32)],
        ),
        compiler_params=pltpu.CompilerParams(
            dimension_semantics=("parallel", "parallel", "arbitrary"),
            vmem_limit_bytes=_vmem_limit(vmem)),
    )(d, W, b2)


def _reference(d, W, b, *, diag=False):
    if diag:
        W = W * jnp.eye(W.shape[0], dtype=W.dtype)
    g = jnp.maximum(d @ W.T + b, 0.0)
    return jnp.exp(-g)


if __name__ == "__main__":
    base_key = jax.random.PRNGKey(0)

    def make_inputs(batch, input_size, output_size):
        k = jax.random.fold_in(base_key, batch * 10000 + input_size * 100 + output_size)
        k_w, k_b, k_d = jax.random.split(k, 3)
        # Mirrors reset_parameters(): U(-stdv, stdv), stdv = 1/sqrt(output_size).
        stdv = 1.0 / math.sqrt(output_size)
        W = jax.random.uniform(k_w, (output_size, input_size), jnp.float32,
                               minval=-stdv, maxval=stdv)
        b = jax.random.uniform(k_b, (output_size,), jnp.float32,
                               minval=-stdv, maxval=stdv)
        # "d" is a (non-negative) time-delta matrix in the original model.
        d = jax.random.uniform(k_d, (batch, input_size), jnp.float32,
                               minval=0.0, maxval=5.0)
        return d, W, b

    ok = True
    # (batch, input_size, output_size): the module's real shape plus a
    # non-lane-aligned shape to exercise unpadded (no wrapper pad/slice) blocks.
    for (Bsz, Isz, Osz) in [(8, 32, 32), (40, 48, 48)]:
        d, W, b = make_inputs(Bsz, Isz, Osz)
        for diag in (False, True):
            if diag and Isz != Osz:
                continue
            out = jax.block_until_ready(temporal_decay(d, W, b, diag=diag))
            ref = _reference(d, W, b, diag=diag)
            if out.shape != ref.shape or not jnp.allclose(out, ref, atol=1e-5, rtol=1e-5):
                ok = False
                print(f"MISMATCH B={Bsz} I={Isz} O={Osz} diag={diag}: max abs err "
                      f"{float(jnp.max(jnp.abs(out - ref)))}")

    if ok:
        print("KERNEL_OK")
</pallas_src>

<mosaic_0001>
module attributes {stable_mosaic.version = 11 : i64} {
  func.func @_td_matmul_kernel(%arg0: i32, %arg1: i32, %arg2: i32, %arg3: memref<8x32xf32, #tpu.memory_space<vmem>>, %arg4: memref<32x32xf32, #tpu.memory_space<vmem>>, %arg5: memref<1x32xf32, #tpu.memory_space<vmem>>, %arg6: memref<8x32xf32, #tpu.memory_space<vmem>>, %arg7: memref<8x32xf32, #tpu.memory_space<vmem>>) attributes {dimension_semantics = [#tpu.dimension_semantics<parallel>, #tpu.dimension_semantics<parallel>, #tpu.dimension_semantics<arbitrary>], iteration_bounds = array<i64: 1, 1, 1>, scalar_prefetch = 0 : i64, scratch_operands = 1 : i64, tpu.core_type = #tpu.core_type<tc>, window_params = [{transform_indices = @transform_0, window_bounds = array<i64: 8, 32>}, {transform_indices = @transform_1, window_bounds = array<i64: 32, 32>}, {transform_indices = @transform_2, window_bounds = array<i64: 1, 32>}, {transform_indices = @transform_3, window_bounds = array<i64: 8, 32>}]} {
    %c0 = arith.constant 0 : index
    %c0_0 = arith.constant 0 : index
    %0 = vector.load %arg3[%c0, %c0_0] : memref<8x32xf32, #tpu.memory_space<vmem>>, vector<8x32xf32>
    %c0_1 = arith.constant 0 : index
    %c0_2 = arith.constant 0 : index
    %1 = vector.load %arg4[%c0_1, %c0_2] : memref<32x32xf32, #tpu.memory_space<vmem>>, vector<32x32xf32>
    %cst = arith.constant dense<0.000000e+00> : vector<8x32xf32>
    %2 = tpu.matmul %0, %1, %cst {dimension_numbers = #tpu.dot_dimension_numbers<[1], [1], [0], [0], [0, 0, 1, 0], [], []>} : vector<8x32xf32>, vector<32x32xf32>, vector<8x32xf32> -> vector<8x32xf32>
    %c0_3 = arith.constant 0 : index
    %c0_4 = arith.constant 0 : index
    %3 = vector.load %arg5[%c0_3, %c0_4] : memref<1x32xf32, #tpu.memory_space<vmem>>, vector<1x32xf32>
    %4 = vector.broadcast %3 : vector<1x32xf32> to vector<8x32xf32>
    %5 = arith.addf %2, %4 : vector<8x32xf32>
    %cst_5 = arith.constant 0.000000e+00 : f32
    %6 = vector.broadcast %cst_5 : f32 to vector<8x32xf32>
    %7 = arith.maximumf %5, %6 : vector<8x32xf32>
    %cst_6 = arith.constant 0.000000e+00 : f32
    %8 = vector.broadcast %cst_6 : f32 to vector<8x32xf32>
    %9 = arith.subf %8, %7 : vector<8x32xf32>
    %10 = math.exp %9 : vector<8x32xf32>
    %c0_7 = arith.constant 0 : index
    %c0_8 = arith.constant 0 : index
    %11 = vector.load %arg6[%c0_7, %c0_8] : memref<8x32xf32, #tpu.memory_space<vmem>>, vector<8x32xf32>
    tpu.vector_store %arg6[%c0_7, %c0_8], %10 {strides = array<i32>} : memref<8x32xf32, #tpu.memory_space<vmem>>, vector<8x32xf32>,
    return
  }
  func.func @transform_0(%arg0: i32, %arg1: i32, %arg2: i32) -> (i32, i32) {
    %c0_i32 = arith.constant 0 : i32
    return %arg0, %arg2 : i32, i32
  }
  func.func @transform_1(%arg0: i32, %arg1: i32, %arg2: i32) -> (i32, i32) {
    %c0_i32 = arith.constant 0 : i32
    return %arg1, %arg2 : i32, i32
  }
  func.func @transform_2(%arg0: i32, %arg1: i32, %arg2: i32) -> (i32, i32) {
    %c0_i32 = arith.constant 0 : i32
    %c0_i32_0 = arith.constant 0 : i32
    return %c0_i32, %arg1 : i32, i32
  }
  func.func @transform_3(%arg0: i32, %arg1: i32, %arg2: i32) -> (i32, i32) {
    %c0_i32 = arith.constant 0 : i32
    return %arg0, %arg1 : i32, i32
  }
}

</mosaic_0001>

<bundles_post_ra>
// kernel: tpu_custom_call.1
= control target key start
LH: loop header
LB: loop body
LE: loop exit
PB: predicated region body
PF: predicated region fallthrough
CT: control target
= control target key end

     0   :  { %8 = vsyncpa [#allocation4], 0  ;;  %s302_s0 = inlined_call_operand.hbm [shape: f32[8,32], index: 0, kind: input, shape index: {}]   ;;  %s303_s1 = inlined_call_operand.hbm [shape: f32[32,32], index: 1, kind: input, shape index: {}]   ;;  %s304_s2 = inlined_call_operand.vmem [shape: f32[1,32], index: 2, kind: input, shape index: {}]   ;;  %s305_s3 = inlined_call_operand.hbm [shape: f32[8,32], index: 3, kind: output, shape index: {}]  }
   0x1   :  { %9 = vsyncpa [#allocation7], 0 }
   0x2   :  { %10 = vsyncpa [#allocation5], 0  ;;  %s257_s12 = smov [#allocation3]   ;;  %s258_s14 = smov [#allocation6]  }
   0x3   :  { %s17_s13 = sshll.u32 %s257_s12, 4  ;;  %s26_s15 = sshll.u32 %s258_s14, 4  ;;  %s18_s13 = int_to_ptr.vmem [resolvable:$true] %s17_s13  ;;  %s27_s15 = int_to_ptr.vmem [resolvable:$true] %s26_s15 }
   0x4   :  { %s199_s16 = scalar_lea.vmem %s18_s13, 128  ;;  %p204_p1 = scmp.lt.s32.totalorder %s18_s13, %s18_s13 }
   0x5   :  { %p200_p0 = scmp.ne.s32.totalorder %s18_s13, %s199_s16  ;;  %p205_p2 = scmp.lt.s32.totalorder %s199_s16, %s199_s16 }
   0x7   :  { %p206_p3 = por %p205_p2, %p204_p1 }
   0x9   :  { %p207_p4 = pnand %p206_p3, %p200_p0 }
   0xb   :  { %210 = shalt.err (!%p207_p4)
}
   0xc   :  { %20 = dma.hbm_to_vmem [thread:$0]  %s302_s0, 128, %s18_s13, [#allocation4]  }
   0xd   :  { %s219_s19 = scalar_lea.vmem %s27_s15, 512  ;;  %p224_p6 = scmp.lt.s32.totalorder %s27_s15, %s27_s15 }
   0xe   :  { %p220_p5 = scmp.ne.s32.totalorder %s27_s15, %s219_s19  ;;  %p225_p7 = scmp.lt.s32.totalorder %s219_s19, %s219_s19 }
  0x10   :  { %p226_p8 = por %p225_p7, %p224_p6 }
  0x12   :  { %p227_p9 = pnand %p226_p8, %p220_p5 }
  0x14   :  { %230 = shalt.err (!%p227_p9)
}
  0x15   :  { %s259_s20 = smov 128   ;;  %s260_s21 = smov 8  }
  0x16   :  { %32 = dma.hbm_to_vmem [thread:$0]  %s303_s1, 512, %s27_s15, [#allocation7], %s259_s20, %s259_s20, %s260_s21  }
  0x17   :  { %251 = dma.done.wait [#allocation4], 128  }
  0x18   :  { %252 = vsyncadd [#allocation4], 4294967168 }
  0x19   :  { %253 = dma.done.wait [#allocation7], 512  }
  0x1a   :  { %254 = vsyncadd [#allocation7], 4294966784  ;;  %v261_v0 = vmov 0.0   ;;  %vm262_vm0 = vmmov 0   ;;  %vm53_vm1 = vcmask 261120   ;;  %v45_v1 = vld [vmem:[#allocation6 + $0x18] sm:$0xff] }
  0x1b   :  { %171 = vmatprep.subr.mxu0 %v261_v0  ;;  %179 = vmatprep.mubr.msk.f32.mxu0 %vm262_vm0, %v261_v0  ;;  %v44_v2 = vld [vmem:[#allocation6 + $0x10] sm:$0xff]  ;;  %v43_v3 = vld [vmem:[#allocation6 + $0x8] sm:$0xff]  ;;  %v42_v4 = vld [vmem:[#allocation6] sm:$0xff]  ;;  %s263_s24 = smov [#allocation8]  }
  0x1c   :  { %172 = vmatpush3.xpose.msk.msra.mxu0 %vm53_vm1, %v45_v1  ;;  %v41_v5 = vld [vmem:[#allocation3] sm:$0xff]  ;;  %s150_s25 = sshll.u32 %s263_s24, 4  ;;  %s151_s25 = int_to_ptr.vmem [resolvable:$true] %s150_s25 }
  0x1d   :  { %173 = vmatprep.subr.mxu0 %v261_v0  ;;  %v160_v6 = vld [vmem:[%s304_s2] ss:$0 sm:$0xff]  ;;  %s231_s26 = scalar_lea.vmem %s151_s25, 128  ;;  %p236_p11 = scmp.lt.s32.totalorder %s151_s25, %s151_s25 }
  0x1e   :  { %p232_p10 = scmp.ne.s32.totalorder %s151_s25, %s231_s26  ;;  %p237_p12 = scmp.lt.s32.totalorder %s231_s26, %s231_s26 }
  0x20   :  { %174 = vmatpush3.xpose.msk.msra.mxu0 %vm53_vm1, %v44_v2  ;;  %p238_p13 = por %p237_p12, %p236_p11 }
  0x21   :  { %175 = vmatprep.subr.mxu0 %v261_v0 }
  0x22   :  { %p239_p0 = pnand %p238_p13, %p232_p10 }
  0x24   :  { %176 = vmatpush3.xpose.msk.msra.mxu0 %vm53_vm1, %v43_v3 }
  0x25   :  { %177 = vmatprep.subr.mxu0 %v261_v0 }
  0x28   :  { %178 = vmatpush3.xpose.msk.msra.mxu0 %vm53_vm1, %v42_v4 }
  0x2b   :  { %180 = vmatmul.mubr.msk.f32.vlgmr.msra.gmra.mxu0 %vm53_vm1, %v41_v5 }
  0xeb   :  { %v135_v7 = vpop.f32.mrf.mxu0 }
  0xec   :  { %v136_v8 = vadd.f32 %v160_v6, %v135_v7 }
  0xed   :  { %v181_v9 = vpop.f32.mrf.mxu0 }
  0xee   :  { %v139_v10 = vmax.f32 %v136_v8, 0.0 }
  0xf0   :  { %v140_v11 = vsub.f32 0.0, %v139_v10 }
  0xf2   :  { %v141_v12 = vmul.f32 1.442695, %v140_v11 }
  0xf4   :  { %189 = vpow2.f32 %v141_v12 }
 0x101   :  { %v190_v13 = vpop.eup %189 }
 0x102   :  { %143 = vst.msk [vmem:[#allocation8] sm:$0xff] %vm53_vm1, %v190_v13 }
 0x103   :  { %242 = shalt.err (!%p239_p0)
}
 0x104   :  { %153 = dma.vmem_to_hbm [thread:$0]  %s151_s25, 128, %s305_s3, [#allocation5]  }
 0x105   :  { %255 = dma.done.wait [#allocation5], 128  }
 0x106   :  { %256 = vsyncadd [#allocation5], 4294967168 }
 0x107   :  { %157 = vsyncpa [#allocation4], 1 }
 0x108   :  { %158 = vsyncpa [#allocation7], 1 }
 0x109   :  { %159 = vsyncpa [#allocation5], 1 }

</bundles_post_ra>
